<compile_context>
chip_gen: v7x
topology: tpu7x:2x2x1
jax: 0.10.0
libtpu: 0.0.40
codegen_flags: <defaults>
</compile_context>

<pallas_src>
import numpy as np
import jax
import jax.numpy as jnp
from jax.experimental import pallas as pl
from jax.experimental.pallas import tpu as pltpu


def _cdiv(a, b):
    return (a + b - 1) // b


def _round_up(a, b):
    return _cdiv(a, b) * b


def _make_segment_kernel(alpha, sign, block_rows, num_tiles, valid_rows_last):
    """Kernel computing sum(softplus(sign * (x - alpha))) over one padded segment.

    All per-problem quantities are baked in as static Python constants.
    """
    alpha = float(alpha)
    groups = block_rows // 8

    def kernel(x_ref, o_ref, acc_ref):
        pid = pl.program_id(0)

        @pl.when(pid == 0)
        def _init():
            acc_ref[...] = jnp.zeros_like(acc_ref)

        # Compute in f32 regardless of input dtype (inputs DMA at native width).
        x = x_ref[...].astype(jnp.float32)

        # target: softplus(alpha - x);  nontarget: softplus(x - alpha)
        z = (x - alpha) if sign > 0 else (alpha - x)
        # stable softplus(z) = log1p(exp(z)) = max(z,0) + log1p(exp(-|z|))
        sp = jnp.maximum(z, 0.0) + jnp.log1p(jnp.exp(-jnp.abs(z)))

        def _accum(vals):
            # Fold the (block_rows,128) tile into one (8,128) vreg: pure VPU adds.
            acc_ref[...] += vals.reshape(groups, 8, 128).sum(axis=0)

        if valid_rows_last == block_rows:
            # rows % block_rows == 0: no out-of-bounds rows anywhere, no mask.
            _accum(sp)
        else:
            @pl.when(pid != num_tiles - 1)
            def _full_tile():
                _accum(sp)

            @pl.when(pid == num_tiles - 1)
            def _tail_tile():
                # Only the (single) partial tail tile pays for the row mask.
                rid = jax.lax.broadcasted_iota(jnp.int32, (block_rows, 128), 0)
                _accum(jnp.where(rid < valid_rows_last, sp, 0.0))

        @pl.when(pid == num_tiles - 1)
        def _finalize():
            # Single cross-lane/cross-sublane reduce at the very end.
            o_ref[0, 0] = jnp.sum(acc_ref[...])

    return kernel


def _segment_sum_softplus(x, alpha, sign, block_rows_default):
    """sum_i softplus(sign * (x_i - alpha)) via a streaming Pallas reduction."""
    x = x.reshape(-1)
    n = int(x.shape[0])
    assert n > 0, "segment must be non-empty"

    if not jnp.issubdtype(x.dtype, jnp.floating):
        x = x.astype(jnp.float32)
    dtype = x.dtype

    # Sentinel value whose softplus contribution is exactly 0:
    #   z = sign*(x - alpha) must be very negative  ->  pad x with -sign * BIG.
    big = float(min(1e30, float(jnp.finfo(dtype).max) / 4.0))
    sentinel = -float(sign) * big

    # Minimal sentinel padding to a multiple of 8*128 = 1024 elements so the
    # packed array always has rows % 8 == 0 and rows >= 8.
    n_pad = _round_up(n, 8 * 128)
    if n_pad != n:
        x = jnp.pad(x, (0, n_pad - n), constant_values=sentinel)
    rows = n_pad // 128
    x2d = x.reshape(rows, 128)

    # Block rows: multiple of 8, at most `rows`, default large to amortize
    # per-grid-step overhead (512 KiB f32 block at 1024 rows).
    block_rows = max(8, _round_up(int(block_rows_default), 8))
    block_rows = min(block_rows, rows)
    num_tiles = _cdiv(rows, block_rows)
    valid_rows_last = rows - (num_tiles - 1) * block_rows

    kernel = _make_segment_kernel(alpha, sign, block_rows, num_tiles, valid_rows_last)

    itemsize = jnp.dtype(dtype).itemsize
    cost = pl.CostEstimate(
        flops=10 * n_pad,
        transcendentals=2 * n_pad,
        bytes_accessed=n_pad * itemsize + 4,
    )

    out = pl.pallas_call(
        kernel,
        out_shape=jax.ShapeDtypeStruct((1, 1), jnp.float32),
        grid_spec=pltpu.PrefetchScalarGridSpec(
            num_scalar_prefetch=0,
            grid=(num_tiles,),
            in_specs=[pl.BlockSpec((block_rows, 128), lambda i: (i, 0))],
            out_specs=pl.BlockSpec(
                (1, 1), lambda i: (0, 0),
                memory_space=pltpu.MemorySpace.SMEM,
            ),
            scratch_shapes=[pltpu.VMEM((8, 128), jnp.float32)],
        ),
        compiler_params=pltpu.CompilerParams(
            dimension_semantics=("arbitrary",),
        ),
        cost_estimate=cost,
    )(x2d)
    return out[0, 0]


def calibration_loss(target_llrs, nontarget_llrs, ptar=0.01, block_rows=1024):
    """Pallas implementation of CalibrationLoss.forward. Returns a scalar float32."""
    alpha = float(np.log(ptar / (1.0 - ptar)))
    n_t = int(np.prod(target_llrs.shape))
    n_nt = int(np.prod(nontarget_llrs.shape))

    sum_t = _segment_sum_softplus(target_llrs, alpha, sign=-1.0,
                                  block_rows_default=block_rows)
    sum_nt = _segment_sum_softplus(nontarget_llrs, alpha, sign=+1.0,
                                   block_rows_default=block_rows)

    # Weights applied once to the totals (better precision than per-element).
    return (float(ptar) / n_t) * sum_t + ((1.0 - float(ptar)) / n_nt) * sum_nt


def _reference_loss(target_llrs, nontarget_llrs, ptar=0.01):
    alpha = float(np.log(ptar / (1.0 - ptar)))
    # negative_log_sigmoid(lodds) = log1p(exp(-lodds)) = softplus(-lodds)
    return (ptar * jnp.mean(jax.nn.softplus(alpha - target_llrs))
            + (1.0 - ptar) * jnp.mean(jax.nn.softplus(nontarget_llrs - alpha)))


if __name__ == "__main__":
    key = jax.random.PRNGKey(0)
    k1, k2, k3, k4, k5, k6 = jax.random.split(key, 6)

    # 1) Small: targets skew positive, nontargets skew negative; default tiling.
    t = jax.random.normal(k1, (256,), dtype=jnp.float32) * 2.0 + 3.0
    nt = jax.random.normal(k2, (512,), dtype=jnp.float32) * 2.0 - 3.0
    loss1 = jax.block_until_ready(calibration_loss(t, nt))
    ref1 = _reference_loss(t, nt)
    assert jnp.allclose(loss1, ref1, rtol=1e-5, atol=1e-6), (loss1, ref1)

    # 2) Multi-tile with a partial (masked) last tile and sentinel padding.
    t2 = jax.random.normal(k3, (1000,), dtype=jnp.float32) * 2.0 + 3.0
    nt2 = jax.random.normal(k4, (2500,), dtype=jnp.float32) * 2.0 - 3.0
    loss2 = jax.block_until_ready(calibration_loss(t2, nt2, block_rows=16))
    ref2 = _reference_loss(t2, nt2)
    assert jnp.allclose(loss2, ref2, rtol=1e-5, atol=1e-6), (loss2, ref2)

    # 3) Larger segment, several grid steps per call.
    t3 = jax.random.normal(k5, (7000,), dtype=jnp.float32) * 2.0 + 3.0
    nt3 = jax.random.normal(k6, (50000,), dtype=jnp.float32) * 2.0 - 3.0
    loss3 = jax.block_until_ready(calibration_loss(t3, nt3, block_rows=128))
    ref3 = _reference_loss(t3, nt3)
    assert jnp.allclose(loss3, ref3, rtol=1e-5, atol=1e-6), (loss3, ref3)

    print("KERNEL_OK")
</pallas_src>

<mosaic_0001>
module attributes {stable_mosaic.version = 11 : i64} {
  func.func @kernel(%arg0: i32, %arg1: memref<8x128xf32, #tpu.memory_space<vmem>>, %arg2: memref<1x1xf32, #tpu.memory_space<smem>>, %arg3: memref<8x128xf32, #tpu.memory_space<vmem>>) attributes {dimension_semantics = [#tpu.dimension_semantics<arbitrary>], iteration_bounds = array<i64: 1>, scalar_prefetch = 0 : i64, scratch_operands = 1 : i64, tpu.core_type = #tpu.core_type<tc>, window_params = [{transform_indices = @transform_0, window_bounds = array<i64: 8, 128>}, {transform_indices = @transform_1, window_bounds = array<i64: 1, 1>}]} {
    %c0_i32 = arith.constant 0 : i32
    %0 = arith.cmpi eq, %arg0, %c0_i32 : i32
    %1 = arith.extui %0 : i1 to i32
    %c0_i32_0 = arith.constant 0 : i32
    %2 = arith.cmpi ne, %1, %c0_i32_0 : i32
    scf.if %2 {
      %cst_11 = arith.constant 0.000000e+00 : f32
      %22 = vector.broadcast %cst_11 : f32 to vector<8x128xf32>
      %c0_12 = arith.constant 0 : index
      %c0_13 = arith.constant 0 : index
      %23 = vector.load %arg3[%c0_12, %c0_13] : memref<8x128xf32, #tpu.memory_space<vmem>>, vector<8x128xf32>
      tpu.vector_store %arg3[%c0_12, %c0_13], %22 {strides = array<i32>} : memref<8x128xf32, #tpu.memory_space<vmem>>, vector<8x128xf32>,
    } else {
    }
    %c0 = arith.constant 0 : index
    %c0_1 = arith.constant 0 : index
    %3 = vector.load %arg1[%c0, %c0_1] : memref<8x128xf32, #tpu.memory_space<vmem>>, vector<8x128xf32>
    %cst = arith.constant -4.595120e+00 : f32
    %4 = vector.broadcast %cst : f32 to vector<8x128xf32>
    %5 = arith.subf %4, %3 : vector<8x128xf32>
    %cst_2 = arith.constant 0.000000e+00 : f32
    %6 = vector.broadcast %cst_2 : f32 to vector<8x128xf32>
    %7 = arith.maximumf %5, %6 : vector<8x128xf32>
    %8 = math.absf %5 : vector<8x128xf32>
    %cst_3 = arith.constant 0.000000e+00 : f32
    %9 = vector.broadcast %cst_3 : f32 to vector<8x128xf32>
    %10 = arith.subf %9, %8 : vector<8x128xf32>
    %11 = math.exp %10 : vector<8x128xf32>
    %12 = math.log1p %11 : vector<8x128xf32>
    %13 = arith.addf %7, %12 : vector<8x128xf32>
    %c0_4 = arith.constant 0 : index
    %c0_5 = arith.constant 0 : index
    %14 = vector.load %arg3[%c0_4, %c0_5] : memref<8x128xf32, #tpu.memory_space<vmem>>, vector<8x128xf32>
    %15 = vector.shape_cast %13 : vector<8x128xf32> to vector<1x8x128xf32>
    %cst_6 = arith.constant dense<0.000000e+00> : vector<8x128xf32>
    %16 = vector.multi_reduction <add>, %15, %cst_6 [0] : vector<1x8x128xf32> to vector<8x128xf32>
    %17 = arith.addf %14, %16 : vector<8x128xf32>
    %c0_7 = arith.constant 0 : index
    %c0_8 = arith.constant 0 : index
    %18 = vector.load %arg3[%c0_7, %c0_8] : memref<8x128xf32, #tpu.memory_space<vmem>>, vector<8x128xf32>
    tpu.vector_store %arg3[%c0_7, %c0_8], %17 {strides = array<i32>} : memref<8x128xf32, #tpu.memory_space<vmem>>, vector<8x128xf32>,
    %c0_i32_9 = arith.constant 0 : i32
    %19 = arith.cmpi eq, %arg0, %c0_i32_9 : i32
    %20 = arith.extui %19 : i1 to i32
    %c0_i32_10 = arith.constant 0 : i32
    %21 = arith.cmpi ne, %20, %c0_i32_10 : i32
    scf.if %21 {
      %c0_11 = arith.constant 0 : index
      %c0_12 = arith.constant 0 : index
      %22 = vector.load %arg3[%c0_11, %c0_12] : memref<8x128xf32, #tpu.memory_space<vmem>>, vector<8x128xf32>
      %23 = vector.shape_cast %22 : vector<8x128xf32> to vector<1x8x128xf32>
      %cst_13 = arith.constant dense<0.000000e+00> : vector<1xf32>
      %24 = vector.multi_reduction <add>, %23, %cst_13 [1, 2] : vector<1x8x128xf32> to vector<1xf32>
      %25 = vector.shape_cast %24 : vector<1xf32> to vector<1x1x1xf32>
      %26 = vector.extract %25[0, 0, 0] : f32 from vector<1x1x1xf32>
      %c0_14 = arith.constant 0 : index
      %c0_15 = arith.constant 0 : index
      %27 = memref.load %arg2[%c0_14, %c0_15] : memref<1x1xf32, #tpu.memory_space<smem>>
      memref.store %26, %arg2[%c0_14, %c0_15] : memref<1x1xf32, #tpu.memory_space<smem>>
    } else {
    }
    return
  }
  func.func @transform_0(%arg0: i32) -> (i32, i32) {
    %c0_i32 = arith.constant 0 : i32
    %c0_i32_0 = arith.constant 0 : i32
    return %arg0, %c0_i32 : i32, i32
  }
  func.func @transform_1(%arg0: i32) -> (i32, i32) {
    %c0_i32 = arith.constant 0 : i32
    %c0_i32_0 = arith.constant 0 : i32
    %c0_i32_1 = arith.constant 0 : i32
    return %c0_i32, %c0_i32_0 : i32, i32
  }
}

</mosaic_0001>

<bundles_post_ra>
// kernel: tpu_custom_call.1
= control target key start
LH: loop header
LB: loop body
LE: loop exit
PB: predicated region body
PF: predicated region fallthrough
CT: control target
= control target key end

     0   :  { %6 = vsyncpa [#allocation4], 0  ;;  %s156_s0 = inlined_call_operand.hbm [shape: f32[8,128], index: 0, kind: input, shape index: {}]   ;;  %s157_s1 = inlined_call_operand.hbm [shape: f32[1,1], index: 1, kind: output, shape index: {}]  }
   0x1   :  { %7 = vsyncpa [#allocation5], 0  ;;  %s120_s6 = smov [#allocation3]   ;;  %s84_s10 = scalar_lea.hbm %s156_s0, 128 }
   0x2   :  { %s14_s7 = sshll.u32 %s120_s6, 4  ;;  %p85_p0 = scmp.ne.s32.totalorder %s156_s0, %s84_s10  ;;  %s15_s7 = int_to_ptr.vmem [resolvable:$true] %s14_s7 }
   0x3   :  { %p88_p1 = scmp.lt.u32.totalorder %s84_s10, %s156_s0 }
   0x5   :  { %p90_p2 = pnand %p88_p1, %p85_p0 }
   0x7   :  { %93 = shalt.err (!%p90_p2)
}
   0x8   :  { %s94_s15 = scalar_lea.vmem %s15_s7, 128  ;;  %p99_p4 = scmp.lt.s32.totalorder %s15_s7, %s15_s7 }
   0x9   :  { %p95_p3 = scmp.ne.s32.totalorder %s15_s7, %s94_s15  ;;  %p100_p5 = scmp.lt.s32.totalorder %s94_s15, %s94_s15 }
   0xb   :  { %p101_p6 = por %p100_p5, %p99_p4 }
   0xd   :  { %p102_p7 = pnand %p101_p6, %p95_p3 }
   0xf   :  { %105 = shalt.err (!%p102_p7)
}
  0x10   :  { %17 = dma.hbm_to_vmem [thread:$0]  %s156_s0, 128, %s15_s7, [#allocation4]  }
  0x11   :  { %116 = dma.done.wait [#allocation4], 128  }
  0x12   :  { %117 = vsyncadd [#allocation4], 4294967168  ;;  %v26_v0 = vld [vmem:[#allocation3] sm:$0xff]  ;;  %s106_s20 = scalar_lea.hbm %s157_s1, 16 }
  0x13   :  { %v27_v1 = vsub.f32 -4.59512, %v26_v0  ;;  %p107_p8 = scmp.ne.s32.totalorder %s157_s1, %s106_s20  ;;  %p110_p9 = scmp.lt.u32.totalorder %s106_s20, %s157_s1 }
  0x15   :  { %v29_v2 = vand.u32 2147483647, %v27_v1  ;;  %v28_v12 = vmax.f32 %v27_v1, 0.0  ;;  %p112_p10 = pnand %p110_p9, %p107_p8 }
  0x17   :  { %v30_v3 = vsub.f32 0.0, %v29_v2 }
  0x19   :  { %v31_v4 = vmul.f32 1.442695, %v30_v3 }
  0x1b   :  { %80 = vpow2.f32 %v31_v4 }
  0x25   :  { %v81_v5 = vpop.eup %80 }
  0x26   :  { %v33_v6 = vadd.f32 1.0, %v81_v5  ;;  %v36_v7 = vmul.f32 -0.5, %v81_v5  ;;  %v39_v9 = vand.u32 2147483647, %v81_v5 }
  0x28   :  { %82 = vlog2.f32 %v33_v6  ;;  %v37_v8 = vadd.f32 1.0, %v36_v7  ;;  %vm40_vm0 = vcmp.lt.f32.partialorder %v39_v9, 0.0004427343 }
  0x2a   :  { %v38_v10 = vmul.f32 %v81_v5, %v37_v8 }
  0x32   :  { %v83_v11 = vpop.eup %82 }
  0x33   :  { %v35_v13 = vmul.f32 0.6931472, %v83_v11 }
  0x35   :  { %v41_v14 = vsel %vm40_vm0, %v38_v10, %v35_v13 }
  0x36   :  { %v42_v15 = vadd.f32 %v41_v14, %v28_v12 }
  0x38   :  { %51 = vadd.xlane.f32.xlu0 %v42_v15 }
  0xc5   :  { %v52_v16 = vpop.xlane.xlu0 %51 }
  0xc6   :  { %v53_v17 = vrot.slane %v52_v16, 4 }
  0xc8   :  { %v54_v18 = vadd.f32 %v53_v17, %v52_v16 }
  0xca   :  { %v55_v19 = vrot.slane %v54_v18, 2 }
  0xcc   :  { %v56_v20 = vadd.f32 %v55_v19, %v54_v18 }
  0xce   :  { %v57_v21 = vrot.slane %v56_v20, 1 }
  0xd0   :  { %v58_v22 = vadd.f32 %v57_v21, %v56_v20 }
  0xd2   :  { %76 = vpush %v58_v22 }
 0x103   :  { %s77_s0 = spop %76 }
 0x104   :  { %61 = sst [smem:[#allocation6]] %s77_s0 }
 0x105   :  { %115 = shalt.err (!%p112_p10)
}
 0x106   :  { %s121_s25 = smov [#allocation6]  }
 0x107   :  { %69 = dma.smem_to_hbm %s121_s25, 16, %s157_s1, [#allocation5]  }
 0x108   :  { %118 = dma.done.wait [#allocation5], 16  }
 0x109   :  { %119 = vsyncadd [#allocation5], 4294967280 }
 0x10a   :  { %73 = sfence }
 0x10b   :  { %74 = vsyncpa [#allocation4], 1 }
 0x10c   :  { %75 = vsyncpa [#allocation5], 1 }

</bundles_post_ra>
